<compile_context>
chip_gen: v5e
topology: v5e:2x2
jax: 0.10.0
libtpu: 0.0.40
codegen_flags: <defaults>
</compile_context>

<pallas_src>
import functools

import jax
import jax.numpy as jnp
from jax.experimental import pallas as pl
from jax.experimental.pallas import tpu as pltpu


LANE = 128   # TPU lane width; all feature dims are padded to this (lane-dense layout).
HIDDEN = 512 # hard-coded in the module's classifier


def _round_up(x, m):
    return ((x + m - 1) // m) * m


def _pad_last(x, width):
    pad = width - x.shape[-1]
    if pad == 0:
        return x
    return jnp.pad(x, [(0, 0)] * (x.ndim - 1) + [(0, pad)])


def _pad2d(x, shape):
    return jnp.pad(x, [(0, shape[0] - x.shape[0]), (0, shape[1] - x.shape[1])])


def _pad_rows(x, rows):
    pad = rows - x.shape[0]
    if pad == 0:
        return x
    return jnp.pad(x, [(0, pad)] + [(0, 0)] * (x.ndim - 1))


# ----------------------------------------------------------------------------
# Pallas kernel (single fused call: image projection + concat-head + MLP)
# ----------------------------------------------------------------------------
def fused_multimodal_kernel(text_ref, imgp_ref, wimg_ref, bimg_ref,
                            w1t_ref, w1i_ref, b1_ref, w2_ref, b2_ref, out_ref):
    """Shapes (per-grid-step VMEM blocks; lane dims padded to 128):

      text_ref : (TB, 128)     bf16  CLS-token text features, cols >= Dt zero
      imgp_ref : (TB, 128)     bf16  mean-pooled image channels, cols >= C zero
      wimg_ref : (128, 128)    bf16  image projection weight, zero-padded
      bimg_ref : (1, 128)      f32   image projection bias, cols >= Di zero
      w1t_ref  : (128, 512)    bf16  classifier W1 text block, rows >= Dt zero
      w1i_ref  : (128, 512)    bf16  classifier W1 image block, rows >= Di zero
      b1_ref   : (1, 512)      f32
      w2_ref   : (512, 128)    bf16  cols >= num_classes zero
      b2_ref   : (1, 128)      f32   cols >= num_classes zero
      out_ref  : (TB, 128)     f32   logits live in cols [:num_classes]
    """
    # --- image encoder stand-in: project the (wrapper-pooled) channels.
    img = (jnp.dot(imgp_ref[...], wimg_ref[...],
                   preferred_element_type=jnp.float32) + bimg_ref[...])         # (TB,128) f32

    # --- concat(text, image) @ W1  ==  text @ W1_text + img @ W1_img (two accumulated
    #     dots: no (TB,256) intermediate, no layout concat, no all-zero K rows).
    h = (jnp.dot(text_ref[...], w1t_ref[...], preferred_element_type=jnp.float32)
         + jnp.dot(img.astype(jnp.bfloat16), w1i_ref[...],
                   preferred_element_type=jnp.float32)
         + b1_ref[...])                                                          # (TB,512) f32
    h = jnp.maximum(h, 0.0)                                                      # ReLU in f32
    # TODO(synk): training-mode dropout needs torch-matching RNG; eval mode = identity.
    out_ref[...] = (jnp.dot(h.astype(jnp.bfloat16), w2_ref[...],
                            preferred_element_type=jnp.float32) + b2_ref[...])   # (TB,128) f32


# ----------------------------------------------------------------------------
# One-time parameter preparation (hoisted OUT of the per-forward path)
# ----------------------------------------------------------------------------
def prepare_params(raw):
    """Pad to 128-lane-dense layouts and cast matmul weights to bf16, once."""
    hidden = raw["w1_text"].shape[1]
    return {
        # text encoder stand-in: embedding table kept in bf16 (gathered rows feed MXU)
        "embedding": raw["embedding"].astype(jnp.bfloat16),
        # image encoder stand-in projection (pooling happens in the wrapper)
        "w_img": _pad2d(raw["w_img"], (LANE, LANE)).astype(jnp.bfloat16),
        "b_img": _pad_last(raw["b_img"], LANE).astype(jnp.float32),
        # classifier first linear, split into its text / image K-blocks
        "w1_text": _pad2d(raw["w1_text"], (LANE, hidden)).astype(jnp.bfloat16),
        "w1_img": _pad2d(raw["w1_img"], (LANE, hidden)).astype(jnp.bfloat16),
        "b1": raw["b1"].astype(jnp.float32),
        # classifier second linear, lane-dense output
        "w2": _pad_last(raw["w2"], LANE).astype(jnp.bfloat16),
        "b2": _pad_last(raw["b2"], LANE).astype(jnp.float32),
    }


# ----------------------------------------------------------------------------
# Forward wrapper (tiny activation prep + one fused pallas_call)
# ----------------------------------------------------------------------------
def multi_modal_forward(params, text_input, attention_mask, image_input, *, num_classes):
    # ----- text encoder stand-in -----
    # TODO(synk): pretrained HuggingFace transformer backbone not reproducible;
    # stand-in = embedding of the CLS (position-0) token, mirroring
    # `last_hidden_state[:, 0, :]`.  attention_mask is unused by the stand-in.
    del attention_mask
    cls_ids = text_input[:, 0]                                         # (B,)
    text_feat = jnp.take(params["embedding"], cls_ids, axis=0)         # (B, Dt) bf16
    text_pad = _pad_last(text_feat, LANE)                              # (B, 128) bf16

    # ----- image encoder stand-in: mean-pool over spatial (tiny XLA reduce) -----
    # TODO(synk): pretrained timm CNN backbone not reproducible; stand-in =
    # global average pool + linear projection (projection done inside the kernel).
    B, C, H, W = image_input.shape
    pooled = jnp.mean(image_input.reshape(B, C, H * W), axis=-1)       # (B, C) f32
    pooled_pad = _pad_last(pooled, LANE).astype(jnp.bfloat16)          # (B, 128) bf16

    # ----- explicit batch padding / tiling (f32 sublane = 8) -----
    hidden = params["w1_text"].shape[1]
    B8 = _round_up(B, 8)
    TB = B8 if B8 <= 256 else 256     # v6e/v7x: 256-row tiles fill a 256x256 MXU pass
    B_pad = _round_up(B8, TB)
    text_pad = _pad_rows(text_pad, B_pad)
    pooled_pad = _pad_rows(pooled_pad, B_pad)

    # TODO(synk): for very large B-tiles on v7x (64 MiB VMEM) set vmem_limit_bytes
    # explicitly; at these shapes (resident weights < 0.4 MiB) defaults have headroom.
    out_pad = pl.pallas_call(
        fused_multimodal_kernel,
        out_shape=jax.ShapeDtypeStruct((B_pad, LANE), jnp.float32),
        grid=(B_pad // TB,),
        in_specs=[
            pl.BlockSpec((TB, LANE), lambda i: (i, 0)),       # text
            pl.BlockSpec((TB, LANE), lambda i: (i, 0)),       # pooled image
            pl.BlockSpec((LANE, LANE), lambda i: (0, 0)),     # w_img (VMEM-resident)
            pl.BlockSpec((1, LANE), lambda i: (0, 0)),        # b_img
            pl.BlockSpec((LANE, hidden), lambda i: (0, 0)),   # w1_text
            pl.BlockSpec((LANE, hidden), lambda i: (0, 0)),   # w1_img
            pl.BlockSpec((1, hidden), lambda i: (0, 0)),      # b1
            pl.BlockSpec((hidden, LANE), lambda i: (0, 0)),   # w2
            pl.BlockSpec((1, LANE), lambda i: (0, 0)),        # b2
        ],
        out_specs=pl.BlockSpec((TB, LANE), lambda i: (i, 0)),
        compiler_params=pltpu.CompilerParams(dimension_semantics=("parallel",)),
    )(text_pad, pooled_pad, params["w_img"], params["b_img"],
      params["w1_text"], params["w1_img"], params["b1"],
      params["w2"], params["b2"])

    return out_pad[:B, :num_classes]


# ----------------------------------------------------------------------------
# Deterministic parameter init + pure-JAX reference + demo
# ----------------------------------------------------------------------------
def init_params(key, vocab, text_hidden, img_channels, image_features,
                hidden, num_classes):
    ks = jax.random.split(key, 7)
    scale = 0.02
    return {
        # text encoder stand-in
        "embedding": scale * jax.random.normal(ks[0], (vocab, text_hidden), jnp.float32),
        # image encoder stand-in (timm backbone replaced: TODO(synk))
        "w_img": scale * jax.random.normal(ks[1], (img_channels, image_features), jnp.float32),
        "b_img": jnp.zeros((1, image_features), jnp.float32),
        # classifier: Linear(text+image -> 512) split into text/image K-blocks
        "w1_text": scale * jax.random.normal(ks[2], (text_hidden, hidden), jnp.float32),
        "w1_img": scale * jax.random.normal(ks[3], (image_features, hidden), jnp.float32),
        "b1": scale * jax.random.normal(ks[4], (1, hidden), jnp.float32),
        # classifier: Linear(512 -> num_classes)
        "w2": scale * jax.random.normal(ks[5], (hidden, num_classes), jnp.float32),
        "b2": scale * jax.random.normal(ks[6], (1, num_classes), jnp.float32),
    }


def reference_forward(raw, text_input, image_input):
    """Pure-JAX f32 reference of the stand-in forward (for a loose sanity check)."""
    text_feat = raw["embedding"][text_input[:, 0]]
    B, C, H, W = image_input.shape
    pooled = image_input.reshape(B, C, H * W).mean(-1)
    img_feat = pooled @ raw["w_img"] + raw["b_img"]
    comb = jnp.concatenate([text_feat, img_feat], axis=-1)
    w1 = jnp.concatenate([raw["w1_text"], raw["w1_img"]], axis=0)
    h = jnp.maximum(comb @ w1 + raw["b1"], 0.0)
    return h @ raw["w2"] + raw["b2"]


if __name__ == "__main__":
    key = jax.random.PRNGKey(0)

    # small shapes consistent with the module's forward
    B, S_seq, vocab = 2, 8, 100
    C, H, W = 4, 16, 16
    text_hidden = 32        # text_encoder.model.config.hidden_size (stand-in)
    image_features = 48     # image_encoder.model.num_features (stand-in)
    hidden = HIDDEN         # hard-coded in the module's classifier
    num_classes = 10
    drop_rate = 0.1         # dropout is identity in eval mode

    k_ids, k_img, k_params = jax.random.split(key, 3)
    text_input = jax.random.randint(k_ids, (B, S_seq), 0, vocab, dtype=jnp.int32)
    attention_mask = jnp.ones((B, S_seq), jnp.int32)
    image_input = jax.random.normal(k_img, (B, C, H, W), jnp.float32)

    raw_params = init_params(k_params, vocab, text_hidden, C, image_features,
                             hidden, num_classes)
    params = jax.tree_util.tree_map(jax.block_until_ready, prepare_params(raw_params))

    fwd = jax.jit(functools.partial(multi_modal_forward, num_classes=num_classes))
    logits = fwd(params, text_input, attention_mask, image_input)
    logits = jax.block_until_ready(logits)
    assert logits.shape == (B, num_classes)
    assert logits.dtype == jnp.float32

    ref = reference_forward(raw_params, text_input, image_input)
    assert jnp.allclose(logits, ref, rtol=2e-2, atol=2e-2), (logits, ref)

    print("KERNEL_OK")
</pallas_src>

<mosaic_0001>
module attributes {stable_mosaic.version = 11 : i64} {
  func.func @fused_multimodal_kernel(%arg0: i32, %arg1: memref<8x128xbf16, #tpu.memory_space<vmem>>, %arg2: memref<8x128xbf16, #tpu.memory_space<vmem>>, %arg3: memref<128x128xbf16, #tpu.memory_space<vmem>>, %arg4: memref<1x128xf32, #tpu.memory_space<vmem>>, %arg5: memref<128x512xbf16, #tpu.memory_space<vmem>>, %arg6: memref<128x512xbf16, #tpu.memory_space<vmem>>, %arg7: memref<1x512xf32, #tpu.memory_space<vmem>>, %arg8: memref<512x128xbf16, #tpu.memory_space<vmem>>, %arg9: memref<1x128xf32, #tpu.memory_space<vmem>>, %arg10: memref<8x128xf32, #tpu.memory_space<vmem>>) attributes {dimension_semantics = [#tpu.dimension_semantics<parallel>], iteration_bounds = array<i64: 1>, scalar_prefetch = 0 : i64, scratch_operands = 0 : i64, tpu.core_type = #tpu.core_type<tc>, window_params = [{transform_indices = @transform_0, window_bounds = array<i64: 8, 128>}, {transform_indices = @transform_1, window_bounds = array<i64: 8, 128>}, {pipeline_mode = #tpu.pipeline_mode<synchronous>, transform_indices = @transform_2, window_bounds = array<i64: 128, 128>}, {pipeline_mode = #tpu.pipeline_mode<synchronous>, transform_indices = @transform_3, window_bounds = array<i64: 1, 128>}, {pipeline_mode = #tpu.pipeline_mode<synchronous>, transform_indices = @transform_4, window_bounds = array<i64: 128, 512>}, {pipeline_mode = #tpu.pipeline_mode<synchronous>, transform_indices = @transform_5, window_bounds = array<i64: 128, 512>}, {pipeline_mode = #tpu.pipeline_mode<synchronous>, transform_indices = @transform_6, window_bounds = array<i64: 1, 512>}, {pipeline_mode = #tpu.pipeline_mode<synchronous>, transform_indices = @transform_7, window_bounds = array<i64: 512, 128>}, {pipeline_mode = #tpu.pipeline_mode<synchronous>, transform_indices = @transform_8, window_bounds = array<i64: 1, 128>}, {transform_indices = @transform_9, window_bounds = array<i64: 8, 128>}]} {
    %c0 = arith.constant 0 : index
    %c0_0 = arith.constant 0 : index
    %0 = vector.load %arg2[%c0, %c0_0] : memref<8x128xbf16, #tpu.memory_space<vmem>>, vector<8x128xbf16>
    %c0_1 = arith.constant 0 : index
    %c0_2 = arith.constant 0 : index
    %1 = vector.load %arg3[%c0_1, %c0_2] : memref<128x128xbf16, #tpu.memory_space<vmem>>, vector<128x128xbf16>
    %cst = arith.constant dense<0.000000e+00> : vector<8x128xf32>
    %2 = tpu.matmul %0, %1, %cst {dimension_numbers = #tpu.dot_dimension_numbers<[1], [0], [0], [1], [0, 0, 1, 1], [], []>} : vector<8x128xbf16>, vector<128x128xbf16>, vector<8x128xf32> -> vector<8x128xf32>
    %c0_3 = arith.constant 0 : index
    %c0_4 = arith.constant 0 : index
    %3 = vector.load %arg4[%c0_3, %c0_4] : memref<1x128xf32, #tpu.memory_space<vmem>>, vector<1x128xf32>
    %4 = vector.broadcast %3 : vector<1x128xf32> to vector<8x128xf32>
    %5 = arith.addf %2, %4 : vector<8x128xf32>
    %c0_5 = arith.constant 0 : index
    %c0_6 = arith.constant 0 : index
    %6 = vector.load %arg1[%c0_5, %c0_6] : memref<8x128xbf16, #tpu.memory_space<vmem>>, vector<8x128xbf16>
    %c0_7 = arith.constant 0 : index
    %c0_8 = arith.constant 0 : index
    %7 = vector.load %arg5[%c0_7, %c0_8] : memref<128x512xbf16, #tpu.memory_space<vmem>>, vector<128x512xbf16>
    %cst_9 = arith.constant dense<0.000000e+00> : vector<8x512xf32>
    %8 = tpu.matmul %6, %7, %cst_9 {dimension_numbers = #tpu.dot_dimension_numbers<[1], [0], [0], [1], [0, 0, 1, 1], [], []>} : vector<8x128xbf16>, vector<128x512xbf16>, vector<8x512xf32> -> vector<8x512xf32>
    %9 = arith.truncf %5 : vector<8x128xf32> to vector<8x128xbf16>
    %c0_10 = arith.constant 0 : index
    %c0_11 = arith.constant 0 : index
    %10 = vector.load %arg6[%c0_10, %c0_11] : memref<128x512xbf16, #tpu.memory_space<vmem>>, vector<128x512xbf16>
    %cst_12 = arith.constant dense<0.000000e+00> : vector<8x512xf32>
    %11 = tpu.matmul %9, %10, %cst_12 {dimension_numbers = #tpu.dot_dimension_numbers<[1], [0], [0], [1], [0, 0, 1, 1], [], []>} : vector<8x128xbf16>, vector<128x512xbf16>, vector<8x512xf32> -> vector<8x512xf32>
    %12 = arith.addf %8, %11 : vector<8x512xf32>
    %c0_13 = arith.constant 0 : index
    %c0_14 = arith.constant 0 : index
    %13 = vector.load %arg7[%c0_13, %c0_14] : memref<1x512xf32, #tpu.memory_space<vmem>>, vector<1x512xf32>
    %14 = vector.broadcast %13 : vector<1x512xf32> to vector<8x512xf32>
    %15 = arith.addf %12, %14 : vector<8x512xf32>
    %cst_15 = arith.constant 0.000000e+00 : f32
    %16 = vector.broadcast %cst_15 : f32 to vector<8x512xf32>
    %17 = arith.maximumf %15, %16 : vector<8x512xf32>
    %18 = arith.truncf %17 : vector<8x512xf32> to vector<8x512xbf16>
    %c0_16 = arith.constant 0 : index
    %c0_17 = arith.constant 0 : index
    %19 = vector.load %arg8[%c0_16, %c0_17] : memref<512x128xbf16, #tpu.memory_space<vmem>>, vector<512x128xbf16>
    %cst_18 = arith.constant dense<0.000000e+00> : vector<8x128xf32>
    %20 = tpu.matmul %18, %19, %cst_18 {dimension_numbers = #tpu.dot_dimension_numbers<[1], [0], [0], [1], [0, 0, 1, 1], [], []>} : vector<8x512xbf16>, vector<512x128xbf16>, vector<8x128xf32> -> vector<8x128xf32>
    %c0_19 = arith.constant 0 : index
    %c0_20 = arith.constant 0 : index
    %21 = vector.load %arg9[%c0_19, %c0_20] : memref<1x128xf32, #tpu.memory_space<vmem>>, vector<1x128xf32>
    %22 = vector.broadcast %21 : vector<1x128xf32> to vector<8x128xf32>
    %23 = arith.addf %20, %22 : vector<8x128xf32>
    %c0_21 = arith.constant 0 : index
    %c0_22 = arith.constant 0 : index
    %24 = vector.load %arg10[%c0_21, %c0_22] : memref<8x128xf32, #tpu.memory_space<vmem>>, vector<8x128xf32>
    tpu.vector_store %arg10[%c0_21, %c0_22], %23 {strides = array<i32>} : memref<8x128xf32, #tpu.memory_space<vmem>>, vector<8x128xf32>,
    return
  }
  func.func @transform_0(%arg0: i32) -> (i32, i32) {
    %c0_i32 = arith.constant 0 : i32
    %c0_i32_0 = arith.constant 0 : i32
    return %arg0, %c0_i32 : i32, i32
  }
  func.func @transform_1(%arg0: i32) -> (i32, i32) {
    %c0_i32 = arith.constant 0 : i32
    %c0_i32_0 = arith.constant 0 : i32
    return %arg0, %c0_i32 : i32, i32
  }
  func.func @transform_2(%arg0: i32) -> (i32, i32) {
    %c0_i32 = arith.constant 0 : i32
    %c0_i32_0 = arith.constant 0 : i32
    %c0_i32_1 = arith.constant 0 : i32
    return %c0_i32, %c0_i32_0 : i32, i32
  }
  func.func @transform_3(%arg0: i32) -> (i32, i32) {
    %c0_i32 = arith.constant 0 : i32
    %c0_i32_0 = arith.constant 0 : i32
    %c0_i32_1 = arith.constant 0 : i32
    return %c0_i32, %c0_i32_0 : i32, i32
  }
  func.func @transform_4(%arg0: i32) -> (i32, i32) {
    %c0_i32 = arith.constant 0 : i32
    %c0_i32_0 = arith.constant 0 : i32
    %c0_i32_1 = arith.constant 0 : i32
    return %c0_i32, %c0_i32_0 : i32, i32
  }
  func.func @transform_5(%arg0: i32) -> (i32, i32) {
    %c0_i32 = arith.constant 0 : i32
    %c0_i32_0 = arith.constant 0 : i32
    %c0_i32_1 = arith.constant 0 : i32
    return %c0_i32, %c0_i32_0 : i32, i32
  }
  func.func @transform_6(%arg0: i32) -> (i32, i32) {
    %c0_i32 = arith.constant 0 : i32
    %c0_i32_0 = arith.constant 0 : i32
    %c0_i32_1 = arith.constant 0 : i32
    return %c0_i32, %c0_i32_0 : i32, i32
  }
  func.func @transform_7(%arg0: i32) -> (i32, i32) {
    %c0_i32 = arith.constant 0 : i32
    %c0_i32_0 = arith.constant 0 : i32
    %c0_i32_1 = arith.constant 0 : i32
    return %c0_i32, %c0_i32_0 : i32, i32
  }
  func.func @transform_8(%arg0: i32) -> (i32, i32) {
    %c0_i32 = arith.constant 0 : i32
    %c0_i32_0 = arith.constant 0 : i32
    %c0_i32_1 = arith.constant 0 : i32
    return %c0_i32, %c0_i32_0 : i32, i32
  }
  func.func @transform_9(%arg0: i32) -> (i32, i32) {
    %c0_i32 = arith.constant 0 : i32
    %c0_i32_0 = arith.constant 0 : i32
    return %arg0, %c0_i32 : i32, i32
  }
}

</mosaic_0001>

<bundles_post_ra>
// kernel: multi_modal_forward.1
= control target key start
LH: loop header
LB: loop body
LE: loop exit
PB: predicated region body
PF: predicated region fallthrough
CT: control target
= control target key end

     0   :  { %14 = vsyncpa [#allocation3], 0  ;;  %s1705_s0 = inlined_call_operand.vmem [shape: bf16[8,128], index: 0, kind: input, shape index: {}]   ;;  %s1706_s1 = inlined_call_operand.vmem [shape: bf16[8,128], index: 1, kind: input, shape index: {}]   ;;  %s1707_s2 = inlined_call_operand.vmem [shape: bf16[128,128], index: 2, kind: input, shape index: {}]   ;;  %s1708_s3 = inlined_call_operand.vmem [shape: f32[1,128], index: 3, kind: input, shape index: {}]   ;;  %s1709_s4 = inlined_call_operand.hbm [shape: bf16[128,512], index: 4, kind: input, shape index: {}]   ;;  %s1710_s5 = inlined_call_operand.hbm [shape: bf16[128,512], index: 5, kind: input, shape index: {}]   ;;  %s1711_s6 = inlined_call_operand.vmem [shape: f32[1,512], index: 6, kind: input, shape index: {}]   ;;  %s1712_s7 = inlined_call_operand.hbm [shape: bf16[512,128], index: 7, kind: input, shape index: {}]   ;;  %s1713_s8 = inlined_call_operand.vmem [shape: f32[1,128], index: 8, kind: input, shape index: {}]   ;;  %s1714_s9 = inlined_call_operand.vmem [shape: f32[8,128], index: 9, kind: output, shape index: {}]  }
   0x1   :  { %15 = vsyncpa [#allocation5], 0  ;;  %s41_s11 = sshll.u32 %s1710_s5, 4  ;;  %s1597_s12 = smov [#allocation4]   ;;  %s42_s11 = int_to_ptr.hbm [resolvable:$true] %s41_s11 }
   0x2   :  { %s43_s13 = sshll.u32 %s1597_s12, 4  ;;  %s28_s16 = sshll.u32 %s1709_s4, 4  ;;  %s44_s13 = int_to_ptr.vmem [resolvable:$true] %s43_s13  ;;  %s29_s16 = int_to_ptr.hbm [resolvable:$true] %s28_s16 }
   0x3   :  { %s1598_s17 = smov 256   ;;  %s1599_s18 = smov 16  }
   0x4   :  { %49 = dma.hbm_to_vmem [thread:$0]  %s42_s11, 4096, %s44_s13, [#allocation5], %s1598_s17, %s1598_s17, %s1599_s18  }
   0x5   :  { %s1600_s19 = smov [#allocation2]   ;;  %s56_s23 = sshll.u32 %s1712_s7, 4  ;;  %s57_s23 = int_to_ptr.hbm [resolvable:$true] %s56_s23 }
   0x6   :  { %s30_s20 = sshll.u32 %s1600_s19, 4  ;;  %s1601_s5 = smov [#allocation6]   ;;  %s31_s20 = int_to_ptr.vmem [resolvable:$true] %s30_s20 }
   0x7   :  { %36 = dma.hbm_to_vmem [thread:$0]  %s29_s16, 4096, %s31_s20, [#allocation3], %s1598_s17, %s1598_s17, %s1599_s18  }
   0x8   :  { %s58_s24 = sshll.u32 %s1601_s5, 4  ;;  %s1602_s25 = smov 64   ;;  %s59_s24 = int_to_ptr.vmem [resolvable:$true] %s58_s24 }
   0x9   :  { %s1603_s26 = smov 4  }
   0xa   :  { %64 = dma.hbm_to_vmem [thread:$0]  %s57_s23, 4096, %s59_s24, [#allocation5], %s1602_s25, %s1602_s25, %s1603_s26  }
   0xb   :  { %1593 = dma.done.wait [#allocation3], 4096  }
   0xc   :  { %1594 = vsyncadd [#allocation3], 4294963200 }
   0xd   :  { %1595 = dma.done.wait [#allocation5], 8192  }
   0xe   :  { %1596 = vsyncadd [#allocation5], 4294959104  ;;  %v1415_v0 = vld [vmem:[%s1707_s2 + $0x38] sm:$0xff]  ;;  %v1414_v1 = vld [vmem:[%s1707_s2 + $0x30] sm:$0xff] }
   0xf   :  { %148 = vmatpush.bf16.msra.mxu0 %v1415_v0  ;;  %v1138_v2 = vld [vmem:[#allocation4 + $0xe0] sm:$0xf]  ;;  %v1478_v3 = vld [vmem:[#allocation4 + $0xec] sm:$0xf0]  ;;  %v1476_v4 = vld [vmem:[#allocation4 + $0xe4] sm:$0xf] }
  0x10   :  { %v1139_v5 = vor.u32 %v1478_v3, %v1138_v2  ;;  %v1140_v6 = vld [vmem:[#allocation4 + $0xf0] sm:$0xf0]  ;;  %v1146_v7 = vld [vmem:[#allocation4 + $0xe8] sm:$0xf]  ;;  %v1479_v8 = vld [vmem:[#allocation4 + $0xf4] sm:$0xf0] }
  0x11   :  { %v1413_v9 = vld [vmem:[%s1707_s2 + $0x28] sm:$0xff]  ;;  %v1143_v10 = vor.u32 %v1476_v4, %v1140_v6  ;;  %v1147_v11 = vor.u32 %v1479_v8, %v1146_v7  ;;  %v1122_v12 = vld [vmem:[#allocation4 + $0xc0] sm:$0xf]  ;;  %v1474_v13 = vld [vmem:[#allocation4 + $0xcc] sm:$0xf0] }
  0x12   :  { %387 = vmatpush.bf16.msra.mxu1 %v1139_v5  ;;  %v1472_v14 = vld [vmem:[#allocation4 + $0xc4] sm:$0xf]  ;;  %v1124_v15 = vld [vmem:[#allocation4 + $0xd0] sm:$0xf0]  ;;  %v1123_v16 = vor.u32 %v1474_v13, %v1122_v12  ;;  %v1130_v18 = vld [vmem:[#allocation4 + $0xc8] sm:$0xf] }
  0x13   :  { %149 = vmatpush.bf16.msra.mxu0 %v1414_v1  ;;  %400 = vmatpush.bf16.msra.mxu2 %v1143_v10  ;;  %v1127_v17 = vor.u32 %v1472_v14, %v1124_v15  ;;  %v1475_v19 = vld [vmem:[#allocation4 + $0xd4] sm:$0xf0]  ;;  %v1106_v21 = vld [vmem:[#allocation4 + $0xa0] sm:$0xf]  ;;  %v1470_v22 = vld [vmem:[#allocation4 + $0xac] sm:$0xf0] }
  0x14   :  { %413 = vmatpush.bf16.msra.mxu3 %v1147_v11  ;;  %v1131_v20 = vor.u32 %v1475_v19, %v1130_v18  ;;  %v1468_v23 = vld [vmem:[#allocation4 + $0xa4] sm:$0xf]  ;;  %v1108_v24 = vld [vmem:[#allocation4 + $0xb0] sm:$0xf0]  ;;  %v1114_v25 = vld [vmem:[#allocation4 + $0xa8] sm:$0xf]  ;;  %v1107_v27 = vor.u32 %v1470_v22, %v1106_v21 }
  0x15   :  { %v1412_v26 = vld [vmem:[%s1707_s2 + $0x20] sm:$0xff]  ;;  %v1471_v28 = vld [vmem:[#allocation4 + $0xb4] sm:$0xf0]  ;;  %v1111_v29 = vor.u32 %v1468_v23, %v1108_v24  ;;  %v1466_v32 = vld [vmem:[#allocation4 + $0x8c] sm:$0xf0] }
  0x16   :  { %388 = vmatpush.bf16.msra.mxu1 %v1123_v16  ;;  %v1115_v30 = vor.u32 %v1471_v28, %v1114_v25  ;;  %v1090_v31 = vld [vmem:[#allocation4 + $0x80] sm:$0xf]  ;;  %v1464_v33 = vld [vmem:[#allocation4 + $0x84] sm:$0xf]  ;;  %v1092_v34 = vld [vmem:[#allocation4 + $0x90] sm:$0xf0] }
  0x17   :  { %150 = vmatpush.bf16.msra.mxu0 %v1413_v9  ;;  %401 = vmatpush.bf16.msra.mxu2 %v1127_v17  ;;  %v1098_v35 = vld [vmem:[#allocation4 + $0x88] sm:$0xf]  ;;  %v1467_v36 = vld [vmem:[#allocation4 + $0x94] sm:$0xf0]  ;;  %v1091_v38 = vor.u32 %v1466_v32, %v1090_v31  ;;  %v1095_v39 = vor.u32 %v1464_v33, %v1092_v34  ;;  %v1074_v41 = vld [vmem:[#allocation4 + $0x60] sm:$0xf] }
  0x18   :  { %414 = vmatpush.bf16.msra.mxu3 %v1131_v20  ;;  %v1411_v37 = vld [vmem:[%s1707_s2 + $0x18] sm:$0xff]  ;;  %v1099_v40 = vor.u32 %v1467_v36, %v1098_v35  ;;  %v1462_v42 = vld [vmem:[#allocation4 + $0x6c] sm:$0xf0]  ;;  %v1460_v43 = vld [vmem:[#allocation4 + $0x64] sm:$0xf] }
  0x19   :  { %v1076_v44 = vld [vmem:[#allocation4 + $0x70] sm:$0xf0]  ;;  %v1082_v45 = vld [vmem:[#allocation4 + $0x68] sm:$0xf]  ;;  %v1463_v46 = vld [vmem:[#allocation4 + $0x74] sm:$0xf0]  ;;  %v1075_v48 = vor.u32 %v1462_v42, %v1074_v41 }
  0x1a   :  { %389 = vmatpush.bf16.msra.mxu1 %v1107_v27  ;;  %v1410_v47 = vld [vmem:[%s1707_s2 + $0x10] sm:$0xff]  ;;  %v1079_v49 = vor.u32 %v1460_v43, %v1076_v44  ;;  %v1083_v50 = vor.u32 %v1463_v46, %v1082_v45  ;;  %v1058_v51 = vld [vmem:[#allocation4 + $0x40] sm:$0xf]  ;;  %v1456_v53 = vld [vmem:[#allocation4 + $0x44] sm:$0xf] }
  0x1b   :  { %151 = vmatpush.bf16.msra.mxu0 %v1412_v26  ;;  %402 = vmatpush.bf16.msra.mxu2 %v1111_v29  ;;  %v1458_v52 = vld [vmem:[#allocation4 + $0x4c] sm:$0xf0]  ;;  %v1060_v54 = vld [vmem:[#allocation4 + $0x50] sm:$0xf0]  ;;  %v1066_v55 = vld [vmem:[#allocation4 + $0x48] sm:$0xf] }
  0x1c   :  { %415 = vmatpush.bf16.msra.mxu3 %v1115_v30  ;;  %v1459_v56 = vld [vmem:[#allocation4 + $0x54] sm:$0xf0]  ;;  %v1409_v57 = vld [vmem:[%s1707_s2 + $0x8] sm:$0xff]  ;;  %v1059_v58 = vor.u32 %v1458_v52, %v1058_v51  ;;  %v1063_v60 = vor.u32 %v1456_v53, %v1060_v54  ;;  %v1042_v62 = vld [vmem:[#allocation4 + $0x20] sm:$0xf] }
  0x1d   :  { %v1477_v59 = vld [vmem:[#allocation4 + $0xec] sm:$0xf]  ;;  %v1067_v61 = vor.u32 %v1459_v56, %v1066_v55  ;;  %v1454_v63 = vld [vmem:[#allocation4 + $0x2c] sm:$0xf0]  ;;  %v1148_v0 = vld [vmem:[#allocation4 + $0xf8] sm:$0xf0] }
  0x1e   :  { %390 = vmatpush.bf16.msra.mxu1 %v1091_v38  ;;  %v1452_v1 = vld [vmem:[#allocation4 + $0x24] sm:$0xf]  ;;  %v1044_v2 = vld [vmem:[#allocation4 + $0x30] sm:$0xf0]  ;;  %v1050_v3 = vld [vmem:[#allocation4 + $0x28] sm:$0xf]  ;;  %v1043_v8 = vor.u32 %v1454_v63, %v1042_v62  ;;  %v1151_v9 = vor.u32 %v1477_v59, %v1148_v0 }
  0x1f   :  { %152 = vmatpush.bf16.msra.mxu0 %v1411_v37  ;;  %403 = vmatpush.bf16.msra.mxu2 %v1095_v39  ;;  %v1455_v4 = vld [vmem:[#allocation4 + $0x34] sm:$0xf0]  ;;  %v1408_v5 = vld [vmem:[%s1707_s2] sm:$0xff]  ;;  %v1473_v6 = vld [vmem:[#allocation4 + $0xcc] sm:$0xf]  ;;  %v1047_v10 = vor.u32 %v1452_v1, %v1044_v2 }
  0x20   :  { %416 = vmatpush.bf16.msra.mxu3 %v1099_v40  ;;  %v1132_v7 = vld [vmem:[#allocation4 + $0xd8] sm:$0xf0]  ;;  %v1026_v11 = vld [vmem:[#allocation4] sm:$0xf]  ;;  %v1450_v12 = vld [vmem:[#allocation4 + $0xc] sm:$0xf0]  ;;  %v1051_v15 = vor.u32 %v1455_v4, %v1050_v3 }
  0x21   :  { %v1448_v13 = vld [vmem:[#allocation4 + $0x4] sm:$0xf]  ;;  %v79_v14 = vld [vmem:[%s1706_s1] sm:$0xf]  ;;  %v1028_v16 = vld [vmem:[#allocation4 + $0x10] sm:$0xf0]  ;;  %v1027_v22 = vor.u32 %v1450_v12, %v1026_v11  ;;  %v1135_v26 = vor.u32 %v1473_v6, %v1132_v7 }
  0x22   :  { %391 = vmatpush.bf16.msra.mxu1 %v1075_v48  ;;  %v1034_v17 = vld [vmem:[#allocation4 + $0x8] sm:$0xf]  ;;  %v1451_v18 = vld [vmem:[#allocation4 + $0x14] sm:$0xf0]  ;;  %v1266_v19 = vld [vmem:[#allocation2 + $0xe0] sm:$0xf]  ;;  %v1031_v27 = vor.u32 %v1448_v13, %v1028_v16 }
  0x23   :  { %153 = vmatpush.bf16.msra.mxu0 %v1410_v47  ;;  %404 = vmatpush.bf16.msra.mxu2 %v1079_v49  ;;  %v1446_v20 = vld [vmem:[#allocation2 + $0xec] sm:$0xf0]  ;;  %v1444_v21 = vld [vmem:[#allocation2 + $0xe4] sm:$0xf]  ;;  %v1268_v23 = vld [vmem:[#allocation2 + $0xf0] sm:$0xf0]  ;;  %v1035_v30 = vor.u32 %v1451_v18, %v1034_v17 }
  0x24   :  { %417 = vmatpush.bf16.msra.mxu3 %v1083_v50  ;;  %v1274_v24 = vld [vmem:[#allocation2 + $0xe8] sm:$0xf]  ;;  %v1447_v25 = vld [vmem:[#allocation2 + $0xf4] sm:$0xf0]  ;;  %v1469_v28 = vld [vmem:[#allocation4 + $0xac] sm:$0xf]  ;;  %v1267_v31 = vor.u32 %v1446_v20, %v1266_v19  ;;  %v1271_v32 = vor.u32 %v1444_v21, %v1268_v23 }
  0x25   :  { %v1116_v29 = vld [vmem:[#allocation4 + $0xb8] sm:$0xf0]  ;;  %v1275_v33 = vor.u32 %v1447_v25, %v1274_v24  ;;  %v1250_v34 = vld [vmem:[#allocation2 + $0xc0] sm:$0xf]  ;;  %v1442_v35 = vld [vmem:[#allocation2 + $0xcc] sm:$0xf0] }
  0x26   :  { %392 = vmatpush.bf16.msra.mxu1 %v1059_v58  ;;  %v1440_v36 = vld [vmem:[#allocation2 + $0xc4] sm:$0xf]  ;;  %v1252_v37 = vld [vmem:[#allocation2 + $0xd0] sm:$0xf0]  ;;  %v1258_v38 = vld [vmem:[#allocation2 + $0xc8] sm:$0xf]  ;;  %v1119_v40 = vor.u32 %v1469_v28, %v1116_v29  ;;  %v1251_v43 = vor.u32 %v1442_v35, %v1250_v34 }
  0x27   :  { %154 = vmatpush.bf16.msra.mxu0 %v1409_v57  ;;  %405 = vmatpush.bf16.msra.mxu2 %v1063_v60  ;;  %v1443_v39 = vld [vmem:[#allocation2 + $0xd4] sm:$0xf0]  ;;  %v1465_v41 = vld [vmem:[#allocation4 + $0x8c] sm:$0xf]  ;;  %v1100_v42 = vld [vmem:[#allocation4 + $0x98] sm:$0xf0]  ;;  %v1255_v44 = vor.u32 %v1440_v36, %v1252_v37 }
  0x28   :  { %418 = vmatpush.bf16.msra.mxu3 %v1067_v61  ;;  %v1259_v45 = vor.u32 %v1443_v39, %v1258_v38  ;;  %v1234_v46 = vld [vmem:[#allocation2 + $0xa0] sm:$0xf]  ;;  %v1438_v47 = vld [vmem:[#allocation2 + $0xac] sm:$0xf0]  ;;  %v1436_v48 = vld [vmem:[#allocation2 + $0xa4] sm:$0xf]  ;;  %v1103_v52 = vor.u32 %v1465_v41, %v1100_v42 }
  0x29   :  { %v1236_v49 = vld [vmem:[#allocation2 + $0xb0] sm:$0xf0]  ;;  %v1242_v50 = vld [vmem:[#allocation2 + $0xa8] sm:$0xf]  ;;  %v1439_v51 = vld [vmem:[#allocation2 + $0xb4] sm:$0xf0]  ;;  %v1235_v55 = vor.u32 %v1438_v47, %v1234_v46 }
  0x2a   :  { %393 = vmatpush.bf16.msra.mxu1 %v1043_v8  ;;  %v1461_v53 = vld [vmem:[#allocation4 + $0x6c] sm:$0xf]  ;;  %v1084_v54 = vld [vmem:[#allocation4 + $0x78] sm:$0xf0]  ;;  %v1239_v56 = vor.u32 %v1436_v48, %v1236_v49  ;;  %v1243_v57 = vor.u32 %v1439_v51, %v1242_v50  ;;  %v1218_v13 = vld [vmem:[#allocation2 + $0x80] sm:$0xf] }
  0x2b   :  { %155 = vmatpush.bf16.msra.mxu0 %v1408_v5  ;;  %406 = vmatpush.bf16.msra.mxu2 %v1047_v10  ;;  %v1087_v58 = vor.u32 %v1461_v53, %v1084_v54  ;;  %v1457_v59 = vld [vmem:[#allocation4 + $0x4c] sm:$0xf]  ;;  %v1068_v60 = vld [vmem:[#allocation4 + $0x58] sm:$0xf0]  ;;  %v1220_v17 = vld [vmem:[#allocation2 + $0x90] sm:$0xf0] }
  0x2c   :  { %419 = vmatpush.bf16.msra.mxu3 %v1051_v15  ;;  %v1071_v61 = vor.u32 %v1457_v59, %v1068_v60  ;;  %v1453_v62 = vld [vmem:[#allocation4 + $0x2c] sm:$0xf]  ;;  %v1052_v63 = vld [vmem:[#allocation4 + $0x38] sm:$0xf0]  ;;  %v1432_v15 = vld [vmem:[#allocation2 + $0x84] sm:$0xf] }
  0x2d   :  { %v1055_v0 = vor.u32 %v1453_v62, %v1052_v63  ;;  %v1449_v1 = vld [vmem:[#allocation4 + $0xc] sm:$0xf]  ;;  %v1036_v2 = vld [vmem:[#allocation4 + $0x18] sm:$0xf0]  ;;  %v1226_v18 = vld [vmem:[#allocation2 + $0x88] sm:$0xf]  ;;  %v1223_v20 = vor.u32 %v1432_v15, %v1220_v17 }
  0x2e   :  { %156 = vmatmul.bf16.vlgmr.msra.gmra.mxu0 %v79_v14  ;;  %394 = vmatpush.bf16.msra.mxu1 %v1027_v22  ;;  %v1445_v3 = vld [vmem:[#allocation2 + $0xec] sm:$0xf]  ;;  %v1276_v4 = vld [vmem:[#allocation2 + $0xf8] sm:$0xf0]  ;;  %v1039_v5 = vor.u32 %v1449_v1, %v1036_v2  ;;  %v1434_v14 = vld [vmem:[#allocation2 + $0x8c] sm:$0xf0] }
  0x2f   :  { %426 = vmatpush.bf16.msrb.mxu0 %v1151_v9  ;;  %407 = vmatpush.bf16.msra.mxu2 %v1031_v27  ;;  %v1279_v6 = vor.u32 %v1445_v3, %v1276_v4  ;;  %v1441_v7 = vld [vmem:[#allocation2 + $0xcc] sm:$0xf]  ;;  %v1260_v8 = vld [vmem:[#allocation2 + $0xd8] sm:$0xf0]  ;;  %v1219_v16 = vor.u32 %v1434_v14, %v1218_v13  ;;  %v1435_v19 = vld [vmem:[#allocation2 + $0x94] sm:$0xf0] }
  0x30   :  { %420 = vmatpush.bf16.msra.mxu3 %v1035_v30  ;;  %v1263_v9 = vor.u32 %v1441_v7, %v1260_v8  ;;  %v1437_v10 = vld [vmem:[#allocation2 + $0xac] sm:$0xf]  ;;  %v1244_v11 = vld [vmem:[#allocation2 + $0xb8] sm:$0xf0]  ;;  %v1227_v21 = vor.u32 %v1435_v19, %v1226_v18  ;;  %v1202_v25 = vld [vmem:[#allocation2 + $0x60] sm:$0xf] }
  0x31   :  { %v1247_v12 = vor.u32 %v1437_v10, %v1244_v11  ;;  %v1433_v22 = vld [vmem:[#allocation2 + $0x8c] sm:$0xf]  ;;  %v1228_v23 = vld [vmem:[#allocation2 + $0x98] sm:$0xf0]  ;;  %v1428_v27 = vld [vmem:[#allocation2 + $0x64] sm:$0xf] }
  0x32   :  { %599 = vmatpush.bf16.msrb.mxu1 %v1267_v31  ;;  %v1231_v24 = vor.u32 %v1433_v22, %v1228_v23  ;;  %v1204_v29 = vld [vmem:[#allocation2 + $0x70] sm:$0xf0]  ;;  %v1210_v30 = vld [vmem:[#allocation2 + $0x68] sm:$0xf]  ;;  %v1431_v31 = vld [vmem:[#allocation2 + $0x74] sm:$0xf0] }
  0x33   :  { %427 = vmatpush.bf16.msrb.mxu0 %v1135_v26  ;;  %612 = vmatpush.bf16.msrb.mxu2 %v1271_v32  ;;  %v1430_v26 = vld [vmem:[#allocation2 + $0x6c] sm:$0xf0]  ;;  %v1207_v32 = vor.u32 %v1428_v27, %v1204_v29  ;;  %v1429_v34 = vld [vmem:[#allocation2 + $0x6c] sm:$0xf]  ;;  %v1212_v35 = vld [vmem:[#allocation2 + $0x78] sm:$0xf0] }
  0x34   :  { %625 = vmatpush.bf16.msrb.mxu3 %v1275_v33  ;;  %v1203_v28 = vor.u32 %v1430_v26, %v1202_v25  ;;  %v1211_v33 = vor.u32 %v1431_v31, %v1210_v30  ;;  %v1215_v36 = vor.u32 %v1429_v34, %v1212_v35  ;;  %v1186_v37 = vld [vmem:[#allocation2 + $0x40] sm:$0xf]  ;;  %v1426_v38 = vld [vmem:[#allocation2 + $0x4c] sm:$0xf0]  ;;  %v1424_v39 = vld [vmem:[#allocation2 + $0x44] sm:$0xf] }
  0x35   :  { %v1188_v41 = vld [vmem:[#allocation2 + $0x50] sm:$0xf0]  ;;  %v1194_v42 = vld [vmem:[#allocation2 + $0x48] sm:$0xf]  ;;  %v1425_v46 = vld [vmem:[#allocation2 + $0x4c] sm:$0xf] }
  0x36   :  { %600 = vmatpush.bf16.msrb.mxu1 %v1251_v43  ;;  %v1427_v43 = vld [vmem:[#allocation2 + $0x54] sm:$0xf0]  ;;  %v1196_v47 = vld [vmem:[#allocation2 + $0x58] sm:$0xf0]  ;;  %v1170_v48 = vld [vmem:[#allocation2 + $0x20] sm:$0xf] }
  0x37   :  { %428 = vmatpush.bf16.msrb.mxu0 %v1119_v40  ;;  %613 = vmatpush.bf16.msrb.mxu2 %v1255_v44  ;;  %v1187_v40 = vor.u32 %v1426_v38, %v1186_v37  ;;  %v1191_v44 = vor.u32 %v1424_v39, %v1188_v41  ;;  %v1199_v49 = vor.u32 %v1425_v46, %v1196_v47  ;;  %v1422_v50 = vld [vmem:[#allocation2 + $0x2c] sm:$0xf0]  ;;  %v1420_v51 = vld [vmem:[#allocation2 + $0x24] sm:$0xf]  ;;  %v1180_v59 = vld [vmem:[#allocation2 + $0x38] sm:$0xf0] }
  0x38   :  { %626 = vmatpush.bf16.msrb.mxu3 %v1259_v45  ;;  %v1195_v45 = vor.u32 %v1427_v43, %v1194_v42  ;;  %v1171_v53 = vor.u32 %v1422_v50, %v1170_v48  ;;  %v1154_v60 = vld [vmem:[#allocation2] sm:$0xf]  ;;  %v1416_v63 = vld [vmem:[#allocation2 + $0x4] sm:$0xf]  ;;  %v1162_v1 = vld [vmem:[#allocation2 + $0x8] sm:$0xf] }
  0x39   :  { %v1419_v3 = vld [vmem:[#allocation2 + $0x14] sm:$0xf0]  ;;  %v1417_v4 = vld [vmem:[#allocation2 + $0xc] sm:$0xf]  ;;  %v1486_v15 = vld [vmem:[#allocation6 + $0x30] sm:$0xff] }
  0x3a   :  { %601 = vmatpush.bf16.msrb.mxu1 %v1235_v55  ;;  %v1178_v55 = vld [vmem:[#allocation2 + $0x28] sm:$0xf]  ;;  %v1163_v7 = vor.u32 %v1419_v3, %v1162_v1  ;;  %v1487_v13 = vld [vmem:[#allocation6 + $0x38] sm:$0xff]  ;;  %v161_v18 = vld [vmem:[%s1705_s0] sm:$0xf] }
  0x3b   :  { %429 = vmatpush.bf16.msrb.mxu0 %v1103_v52  ;;  %614 = vmatpush.bf16.msrb.mxu2 %v1239_v56  ;;  %v1172_v52 = vld [vmem:[#allocation2 + $0x30] sm:$0xf0]  ;;  %v1423_v56 = vld [vmem:[#allocation2 + $0x34] sm:$0xf0]  ;;  %v1509_v22 = vld [vmem:[#allocation6 + $0xe8] sm:$0xff] }
  0x3c   :  { %627 = vmatpush.bf16.msrb.mxu3 %v1243_v57  ;;  %v1175_v54 = vor.u32 %v1420_v51, %v1172_v52  ;;  %v1421_v57 = vld [vmem:[#allocation2 + $0x2c] sm:$0xf]  ;;  %v1511_v14 = vld [vmem:[#allocation6 + $0xf8] sm:$0xff]  ;;  %v1494_v23 = vld [vmem:[#allocation6 + $0x70] sm:$0xff] }
  0x3d   :  { %v1183_v62 = vor.u32 %v1421_v57, %v1180_v59  ;;  %v1495_v19 = vld [vmem:[#allocation6 + $0x78] sm:$0xff]  ;;  %v1484_v25 = vld [vmem:[#allocation6 + $0x20] sm:$0xff]  ;;  %v1493_v27 = vld [vmem:[#allocation6 + $0x68] sm:$0xff] }
  0x3e   :  { %602 = vmatpush.bf16.msrb.mxu1 %v1219_v16  ;;  %v1510_v16 = vld [vmem:[#allocation6 + $0xf0] sm:$0xff]  ;;  %v1508_v26 = vld [vmem:[#allocation6 + $0xe0] sm:$0xff]  ;;  %v1483_v29 = vld [vmem:[#allocation6 + $0x18] sm:$0xff] }
  0x3f   :  { %430 = vmatpush.bf16.msrb.mxu0 %v1087_v58  ;;  %615 = vmatpush.bf16.msrb.mxu2 %v1223_v20  ;;  %v1179_v58 = vor.u32 %v1423_v56, %v1178_v55  ;;  %v1503_v20 = vld [vmem:[#allocation6 + $0xb8] sm:$0xff]  ;;  %v1492_v31 = vld [vmem:[#allocation6 + $0x60] sm:$0xff]  ;;  %v1506_v34 = vld [vmem:[#allocation6 + $0xd0] sm:$0xff] }
  0x40   :  { %628 = vmatpush.bf16.msrb.mxu3 %v1227_v21  ;;  %v1485_v21 = vld [vmem:[#allocation6 + $0x28] sm:$0xff]  ;;  %v1507_v30 = vld [vmem:[#allocation6 + $0xd8] sm:$0xff]  ;;  %v1490_v39 = vld [vmem:[#allocation6 + $0x50] sm:$0xff] }
  0x41   :  { %v1491_v35 = vld [vmem:[#allocation6 + $0x58] sm:$0xff]  ;;  %v1481_v37 = vld [vmem:[#allocation6 + $0x8] sm:$0xff]  ;;  %v1480_v41 = vld [vmem:[#allocation6] sm:$0xff] }
  0x42   :  { %603 = vmatpush.bf16.msrb.mxu1 %v1203_v28  ;;  %v1501_v28 = vld [vmem:[#allocation6 + $0xa8] sm:$0xff]  ;;  %v1504_v42 = vld [vmem:[#allocation6 + $0xc0] sm:$0xff] }
  0x43   :  { %431 = vmatpush.bf16.msrb.mxu0 %v1071_v61  ;;  %616 = vmatpush.bf16.msrb.mxu2 %v1207_v32  ;;  %v1418_v61 = vld [vmem:[#allocation2 + $0xc] sm:$0xf0]  ;;  %v1500_v32 = vld [vmem:[#allocation6 + $0xa0] sm:$0xff]  ;;  %v1505_v38 = vld [vmem:[#allocation6 + $0xc8] sm:$0xff] }
  0x44   :  { %629 = vmatpush.bf16.msrb.mxu3 %v1211_v33  ;;  %v1155_v2 = vor.u32 %v1418_v61, %v1154_v60  ;;  %v1482_v33 = vld [vmem:[#allocation6 + $0x10] sm:$0xff]  ;;  %v1489_v43 = vld [vmem:[#allocation6 + $0x48] sm:$0xff]  ;;  %v1496_v46 = vld [vmem:[#allocation6 + $0x80] sm:$0xff] }
  0x46   :  { %604 = vmatpush.bf16.msrb.mxu1 %v1187_v40  ;;  %v1498_v40 = vld [vmem:[#allocation6 + $0x90] sm:$0xff] }
  0x47   :  { %432 = vmatpush.bf16.msrb.mxu0 %v1055_v0  ;;  %617 = vmatpush.bf16.msrb.mxu2 %v1191_v44  ;;  %v1156_v0 = vld [vmem:[#allocation2 + $0x10] sm:$0xf0]  ;;  %v1497_v44 = vld [vmem:[#allocation6 + $0x88] sm:$0xff] }
  0x48   :  { %630 = vmatpush.bf16.msrb.mxu3 %v1195_v45  ;;  %v1488_v45 = vld [vmem:[#allocation6 + $0x40] sm:$0xff] }
  0x4a   :  { %605 = vmatpush.bf16.msrb.mxu1 %v1171_v53  ;;  %v651_v53 = vld [vmem:[%s1711_s6] sm:$0xf] }
  0x4b   :  { %433 = vmatpush.bf16.msrb.mxu0 %v1039_v5  ;;  %v1164_v5 = vld [vmem:[#allocation2 + $0x18] sm:$0xf0]  ;;  %618 = vmatpush.bf16.msrb.mxu2 %v1175_v54  ;;  %v653_v56 = vperm.slane %v651_v53, 0  ;;  %v654_v1 = vperm.slane %v651_v53, 1 }
  0x4c   :  { %631 = vmatpush.bf16.msrb.mxu3 %v1179_v58  ;;  %v1167_v8 = vor.u32 %v1417_v4, %v1164_v5  ;;  %v656_v58 = vperm.slane %v651_v53, 3  ;;  %v655_v4 = vperm.slane %v651_v53, 2 }
  0x4e   :  { %606 = vmatpush.bf16.msrb.mxu1 %v1155_v2 }
  0x4f   :  { %638 = vmatpush.bf16.msra.mxu0 %v1279_v6  ;;  %v1159_v6 = vor.u32 %v1416_v63, %v1156_v0 }
  0x50   :  { %632 = vmatpush.bf16.msrb.mxu3 %v1163_v7 }
  0x51   :  { %619 = vmatpush.bf16.msrb.mxu2 %v1159_v6 }
  0x53   :  { %639 = vmatpush.bf16.msra.mxu0 %v1263_v9  ;;  %v1519_v9 = vld [vmem:[%s1708_s3] ss:$0 sm:$0xff] }
  0x57   :  { %640 = vmatpush.bf16.msra.mxu0 %v1247_v12 }
  0x5b   :  { %641 = vmatpush.bf16.msra.mxu0 %v1231_v24  ;;  %v1502_v24 = vld [vmem:[#allocation6 + $0xb0] sm:$0xff] }
  0x5f   :  { %642 = vmatpush.bf16.msra.mxu0 %v1215_v36  ;;  %v1499_v36 = vld [vmem:[#allocation6 + $0x98] sm:$0xff] }
  0x63   :  { %643 = vmatpush.bf16.msra.mxu0 %v1199_v49 }
  0x67   :  { %644 = vmatpush.bf16.msra.mxu0 %v1183_v62 }
  0x6b   :  { %645 = vmatpush.bf16.msra.mxu0 %v1167_v8 }
  0xab   :  { %v157_v10 = vpop.f32.mrf.mxu0 }
  0xac   :  { %v158_v11 = vadd.f32 %v1519_v9, %v157_v10 }
  0xae   :  { %v194_v12 = vpack.c.bf16 %v158_v11, %v158_v11 }
  0xb0   :  { %395 = vmatmul.bf16.vlgmr.msra.gmra.mxu1 %v194_v12  ;;  %408 = vmatmul.bf16.vlgmr.msra.gmra.mxu2 %v194_v12 }
  0xb1   :  { %421 = vmatmul.bf16.vlgmr.msra.gmra.mxu3 %v194_v12  ;;  %434 = vmatmul.bf16.vlgmr.msrb.gmra.mxu0 %v194_v12 }
  0xb2   :  { %933 = vmatpush.bf16.msra.mxu1 %v1487_v13  ;;  %972 = vmatpush.bf16.msrb.mxu0 %v1511_v14 }
  0xb3   :  { %v159_v17 = vpop.f32.mrf.mxu0  ;;  %946 = vmatpush.bf16.msra.mxu2 %v1495_v19  ;;  %959 = vmatpush.bf16.msra.mxu3 %v1503_v20 }
  0xb6   :  { %934 = vmatpush.bf16.msra.mxu1 %v1486_v15  ;;  %973 = vmatpush.bf16.msrb.mxu0 %v1510_v16 }
  0xb7   :  { %947 = vmatpush.bf16.msra.mxu2 %v1494_v23  ;;  %960 = vmatpush.bf16.msra.mxu3 %v1502_v24 }
  0xba   :  { %935 = vmatpush.bf16.msra.mxu1 %v1485_v21  ;;  %974 = vmatpush.bf16.msrb.mxu0 %v1509_v22  ;;  %v1520_v22 = vld [vmem:[%s1713_s8] ss:$0 sm:$0xff] }
  0xbb   :  { %948 = vmatpush.bf16.msra.mxu2 %v1493_v27  ;;  %961 = vmatpush.bf16.msra.mxu3 %v1501_v28 }
  0xbe   :  { %936 = vmatpush.bf16.msra.mxu1 %v1484_v25  ;;  %975 = vmatpush.bf16.msrb.mxu0 %v1508_v26 }
  0xbf   :  { %949 = vmatpush.bf16.msra.mxu2 %v1492_v31  ;;  %962 = vmatpush.bf16.msra.mxu3 %v1500_v32 }
  0xc0   :  { %607 = vmatmul.bf16.vlgmr.msrb.gmra.mxu1 %v161_v18  ;;  %620 = vmatmul.bf16.vlgmr.msrb.gmra.mxu2 %v161_v18 }
  0xc1   :  { %633 = vmatmul.bf16.vlgmr.msrb.gmra.mxu3 %v161_v18  ;;  %646 = vmatmul.bf16.vlgmr.msra.gmra.mxu0 %v161_v18 }
  0xc2   :  { %937 = vmatpush.bf16.msra.mxu1 %v1483_v29  ;;  %976 = vmatpush.bf16.msrb.mxu0 %v1507_v30 }
  0xc3   :  { %950 = vmatpush.bf16.msra.mxu2 %v1491_v35  ;;  %963 = vmatpush.bf16.msra.mxu3 %v1499_v36 }
  0xc6   :  { %938 = vmatpush.bf16.msra.mxu1 %v1482_v33  ;;  %977 = vmatpush.bf16.msrb.mxu0 %v1506_v34 }
  0xc7   :  { %951 = vmatpush.bf16.msra.mxu2 %v1490_v39  ;;  %964 = vmatpush.bf16.msra.mxu3 %v1498_v40 }
  0xca   :  { %939 = vmatpush.bf16.msra.mxu1 %v1481_v37  ;;  %978 = vmatpush.bf16.msrb.mxu0 %v1505_v38 }
  0xcb   :  { %952 = vmatpush.bf16.msra.mxu2 %v1489_v43  ;;  %965 = vmatpush.bf16.msra.mxu3 %v1497_v44 }
  0xce   :  { %940 = vmatpush.bf16.msra.mxu1 %v1480_v41  ;;  %979 = vmatpush.bf16.msrb.mxu0 %v1504_v42 }
  0xcf   :  { %953 = vmatpush.bf16.msra.mxu2 %v1488_v45  ;;  %966 = vmatpush.bf16.msra.mxu3 %v1496_v46 }
 0x12d   :  { %v396_v47 = vpop.f32.mrf.mxu1 }
 0x12e   :  { %v435_v48 = vpop.f32.mrf.mxu0 }
 0x133   :  { %v409_v49 = vpop.f32.mrf.mxu2 }
 0x134   :  { %v422_v50 = vpop.f32.mrf.mxu3 }
 0x135   :  { %v398_v51 = vpop.f32.mrf.mxu1 }
 0x136   :  { %v437_v52 = vpop.f32.mrf.mxu0 }
 0x13b   :  { %v411_v54 = vpop.f32.mrf.mxu2 }
 0x13c   :  { %v424_v55 = vpop.f32.mrf.mxu3 }
 0x13d   :  { %v608_v57 = vpop.f32.mrf.mxu1 }
 0x13e   :  { %v609_v59 = vadd.f32 %v608_v57, %v396_v47  ;;  %v647_v60 = vpop.f32.mrf.mxu0 }
 0x13f   :  { %v648_v61 = vadd.f32 %v647_v60, %v435_v48 }
 0x140   :  { %v661_v62 = vadd.f32 %v653_v56, %v609_v59 }
 0x141   :  { %v664_v63 = vadd.f32 %v656_v58, %v648_v61 }
 0x142   :  { %v665_v0 = vmax.f32 %v661_v62, 0.0 }
 0x143   :  { %v668_v2 = vmax.f32 %v664_v63, 0.0  ;;  %v621_v3 = vpop.f32.mrf.mxu2 }
 0x144   :  { %v669_v5 = vpack.c.bf16 %v665_v0, %v665_v0  ;;  %v622_v6 = vadd.f32 %v621_v3, %v409_v49  ;;  %v634_v7 = vpop.f32.mrf.mxu3 }
 0x145   :  { %v672_v8 = vpack.c.bf16 %v668_v2, %v668_v2  ;;  %v635_v9 = vadd.f32 %v634_v7, %v422_v50  ;;  %v610_v10 = vpop.f32.mrf.mxu1 }
 0x146   :  { %v662_v11 = vadd.f32 %v654_v1, %v622_v6  ;;  %941 = vmatmul.bf16.vlgmr.msra.gmra.mxu1 %v669_v5  ;;  %v649_v12 = vpop.f32.mrf.mxu0 }
 0x147   :  { %v663_v13 = vadd.f32 %v655_v4, %v635_v9  ;;  %980 = vmatmul.bf16.vlgmr.msrb.gmra.mxu0 %v672_v8 }
 0x148   :  { %v666_v14 = vmax.f32 %v662_v11, 0.0 }
 0x149   :  { %v667_v15 = vmax.f32 %v663_v13, 0.0 }
 0x14a   :  { %v670_v16 = vpack.c.bf16 %v666_v14, %v666_v14 }
 0x14b   :  { %v671_v17 = vpack.c.bf16 %v667_v15, %v667_v15  ;;  %v623_v18 = vpop.f32.mrf.mxu2 }
 0x14c   :  { %v636_v19 = vpop.f32.mrf.mxu3  ;;  %954 = vmatmul.bf16.vlgmr.msra.gmra.mxu2 %v670_v16 }
 0x14d   :  { %967 = vmatmul.bf16.vlgmr.msra.gmra.mxu3 %v671_v17 }
 0x1c3   :  { %v942_v20 = vpop.f32.mrf.mxu1 }
 0x1c4   :  { %v981_v21 = vpop.f32.mrf.mxu0  ;;  %v943_v25 = vadd.f32 %v1520_v22, %v942_v20 }
 0x1cb   :  { %v944_v23 = vpop.f32.mrf.mxu1 }
 0x1cc   :  { %v983_v24 = vpop.f32.mrf.mxu0 }
 0x1cf   :  { %v955_v26 = vpop.f32.mrf.mxu2 }
 0x1d0   :  { %v956_v27 = vadd.f32 %v955_v26, %v943_v25  ;;  %v968_v28 = vpop.f32.mrf.mxu3 }
 0x1d2   :  { %v969_v29 = vadd.f32 %v968_v28, %v956_v27 }
 0x1d4   :  { %v982_v30 = vadd.f32 %v981_v21, %v969_v29 }
 0x1d6   :  { %985 = vst [vmem:[%s1714_s9] sm:$0xff] %v982_v30 }
 0x1d7   :  { %v957_v31 = vpop.f32.mrf.mxu2 }
 0x1d8   :  { %v970_v32 = vpop.f32.mrf.mxu3 }
 0x1d9   :  { %990 = vsyncpa [#allocation3], 1 }
 0x1da   :  { %991 = vsyncpa [#allocation5], 1 }

</bundles_post_ra>
